<compile_context>
chip_gen: v7x
topology: tpu7x:2x2x1
jax: 0.10.0
libtpu: 0.0.40
codegen_flags: <defaults>
</compile_context>

<pallas_src>
import math

import jax
import jax.numpy as jnp
from jax.experimental import pallas as pl
from jax.experimental.pallas import tpu as pltpu

_LANE = 128            # lane width (last-dim tiling unit)
_SUB = 8               # sublane count (second-to-last-dim tiling unit, f32)
_MIB = 1024 * 1024


def _round_up(x, m):
    return ((x + m - 1) // m) * m


def _gelu_exact(h):
    # Exact (erf) GELU, matching torch.nn.GELU() default.
    return 0.5 * h * (1.0 + jax.lax.erf(h * (1.0 / math.sqrt(2.0))))


def _pick_chunk(tile_h):
    # Bound the f32 "h" live value: process the hidden tile in <=512-wide
    # sub-chunks so fc2 partial matmuls interleave with GELU of later chunks
    # and vreg/VMEM pressure stays bounded.  tile_h is a multiple of 128.
    if tile_h <= 512:
        return tile_h
    for c in (512, 256, 128):
        if tile_h % c == 0:
            return c
    return tile_h


def _make_direct_kernel(n_chunks, chunk):
    """n_h == 1 and f32 output: accumulate straight into o_ref (no scratch)."""

    def kernel(x_ref, w1_ref, b1_ref, w2_ref, b2_ref, o_ref):
        x = x_ref[...]
        # fc2 bias first; the chunk loop accumulates on top of it.
        o_ref[...] = jnp.broadcast_to(
            b2_ref[...].astype(jnp.float32), o_ref.shape)

        def body(c, carry):
            off = pl.multiple_of(c * chunk, chunk)
            h = jnp.dot(x, w1_ref[:, pl.ds(off, chunk)],
                        preferred_element_type=jnp.float32)
            h = h + b1_ref[:, pl.ds(off, chunk)].astype(jnp.float32)
            h = _gelu_exact(h)
            # dropout: identity (eval mode)
            o_ref[...] += jnp.dot(h.astype(w2_ref.dtype),
                                  w2_ref[pl.ds(off, chunk), :],
                                  preferred_element_type=jnp.float32)
            return carry

        jax.lax.fori_loop(0, n_chunks, body, 0, unroll=True)

    return kernel


def _make_acc_kernel(n_chunks, chunk):
    """General path: hidden-dim reduction over grid axis 1 with f32 scratch."""

    def kernel(x_ref, w1_ref, b1_ref, w2_ref, b2_ref, o_ref, acc_ref):
        j = pl.program_id(1)

        @pl.when(j == 0)
        def _init():
            acc_ref[...] = jnp.zeros_like(acc_ref)

        x = x_ref[...]

        def body(c, carry):
            off = pl.multiple_of(c * chunk, chunk)
            h = jnp.dot(x, w1_ref[:, pl.ds(off, chunk)],
                        preferred_element_type=jnp.float32)
            h = h + b1_ref[:, pl.ds(off, chunk)].astype(jnp.float32)
            h = _gelu_exact(h)
            # dropout: identity (eval mode)
            acc_ref[...] += jnp.dot(h.astype(w2_ref.dtype),
                                    w2_ref[pl.ds(off, chunk), :],
                                    preferred_element_type=jnp.float32)
            return carry

        jax.lax.fori_loop(0, n_chunks, body, 0, unroll=True)

        @pl.when(j == pl.num_programs(1) - 1)
        def _finalize():
            o_ref[...] = (acc_ref[...]
                          + b2_ref[...].astype(jnp.float32)).astype(o_ref.dtype)

    return kernel


def _tpu_vmem_capacity_bytes():
    try:
        info = pltpu.get_tpu_info()
        cap = getattr(info, "vmem_capacity_bytes", None)
        if cap:
            return int(cap)
    except Exception:
        # Hardware query unavailable: be conservative (v7x-sized VMEM).
        pass
    return 64 * _MIB


def mlp_pallas(x, w1, b1, w2, b2, *, tile_m=None, tile_h=None,
               compute_dtype=None, vmem_limit_bytes=None):
    """Fused fc1 -> GELU -> (dropout=id) -> fc2 -> (dropout=id).

    x: (..., Cin); w1: (Cin, H); b1: (H,); w2: (H, Cout); b2: (Cout,).
    compute_dtype: optionally cast x/w1/w2 (e.g. jnp.bfloat16) so both matmuls
    run at the full bf16 MXU rate; accumulation stays f32 either way.  Note
    the fc2 input is cast to w2's dtype (intentional, for MXU rate).
    """
    orig_lead = x.shape[:-1]
    out_dtype = x.dtype
    Cin = x.shape[-1]
    H = w1.shape[1]
    Cout = w2.shape[1]

    x2d = x.reshape(-1, Cin)
    M = x2d.shape[0]

    if compute_dtype is not None:
        x2d = x2d.astype(compute_dtype)
        w1 = w1.astype(compute_dtype)
        w2 = w2.astype(compute_dtype)

    x_bytes = jnp.dtype(x2d.dtype).itemsize
    w_bytes = jnp.dtype(w1.dtype).itemsize
    o_bytes = jnp.dtype(out_dtype).itemsize

    Cout_p = _round_up(Cout, _LANE)     # lane-dense output stores
    H_p = _round_up(H, _LANE)

    # --- device-aware VMEM budgets -------------------------------------------
    vmem_cap = _tpu_vmem_capacity_bytes()
    if vmem_cap <= 96 * _MIB:
        # v7x-like: 64 MiB VMEM per TensorCore, 2 TCs per chip.
        budget = 24 * _MIB
        limit_cap = 52 * _MIB
        split_for_two_cores = True
    else:
        # v5e / v6e: 128 MiB VMEM, one TensorCore.
        budget = 56 * _MIB
        limit_cap = 100 * _MIB
        split_for_two_cores = False

    def working_set(tm, th):
        ch = _pick_chunk(th)
        # Pipelined HBM<->VMEM buffers (conservatively assume double-buffered).
        bufs = 2 * (tm * Cin * x_bytes            # x tile
                    + Cin * th * w_bytes          # w1 tile
                    + th * w_bytes                # b1 tile
                    + th * Cout_p * w_bytes       # w2 tile
                    + Cout_p * w_bytes            # b2 tile
                    + tm * Cout_p * o_bytes)      # out tile
        # In-kernel intermediates: f32 h chunk, its w2-dtype copy, f32 acc,
        # plus a GELU / spill margin.
        inter = (tm * ch * 4 + tm * ch * w_bytes + tm * Cout_p * 4
                 + tm * ch * 2)
        return bufs + inter

    # --- tile selection ------------------------------------------------------
    if tile_m is None:
        tile_m = 512 if M >= 512 else _round_up(M, _SUB)
    tile_m = max(_SUB, _round_up(min(tile_m, _round_up(M, _SUB)), _SUB))

    # v7x: dimension_semantics=("parallel", ...) shards the M axis across the
    # two TensorCores; make sure there are at least two M tiles to shard.
    if split_for_two_cores and M > _SUB and -(-M // tile_m) < 2:
        tile_m = max(_SUB, _round_up(-(-M // 2), _SUB))

    if tile_h is None:
        tile_h = H_p
        # Prefer shrinking tile_h: w1/w2 blocks are indexed only by j and are
        # re-DMA'd for every M tile, so keeping tile_m large minimizes HBM
        # weight traffic (n_m * (Cin*H + H*Cout) bytes).
        while working_set(tile_m, tile_h) > budget and tile_h > _LANE:
            tile_h = _round_up(max(tile_h // 2, _LANE), _LANE)
    else:
        tile_h = min(_round_up(tile_h, _LANE), H_p)
    # Last resort: shrink tile_m.
    while working_set(tile_m, tile_h) > budget and tile_m > _SUB:
        tile_m = _round_up(max(tile_m // 2, _SUB), _SUB)

    chunk = _pick_chunk(tile_h)
    n_chunks = tile_h // chunk

    # --- padding to tile-divisible, lane-dense layouts ------------------------
    M_p = _round_up(M, tile_m)
    if M_p != M:
        x2d = jnp.pad(x2d, ((0, M_p - M), (0, 0)))
    H_fin = _round_up(H, tile_h)
    if H_fin != H:
        # GELU(0) == 0 and the padded w2 rows are zero, so padding is exact.
        w1 = jnp.pad(w1, ((0, 0), (0, H_fin - H)))
        b1 = jnp.pad(b1, (0, H_fin - H))
        w2 = jnp.pad(w2, ((0, H_fin - H), (0, 0)))
    if Cout_p != Cout:
        w2 = jnp.pad(w2, ((0, 0), (0, Cout_p - Cout)))
        b2 = jnp.pad(b2, (0, Cout_p - Cout))

    b1_2d = b1.reshape(1, H_fin)
    b2_2d = b2.reshape(1, Cout_p)

    n_m = M_p // tile_m
    n_h = H_fin // tile_h

    # No hidden-dim reduction + f32 output: accumulate directly in o_ref.
    use_direct = (n_h == 1) and (jnp.dtype(out_dtype) == jnp.dtype(jnp.float32))

    if vmem_limit_bytes is None:
        est = working_set(tile_m, tile_h)
        lim = max(32 * _MIB, min(limit_cap, est + 16 * _MIB))
        lim = max(lim, min(vmem_cap, est + 4 * _MIB))  # never starve the estimate
        vmem_limit_bytes = int(lim)

    cparams = pltpu.CompilerParams(
        dimension_semantics=("parallel", "arbitrary"),
        vmem_limit_bytes=vmem_limit_bytes,
    )
    out_shape = jax.ShapeDtypeStruct((M_p, Cout_p), out_dtype)

    if use_direct:
        kernel = _make_direct_kernel(n_chunks, chunk)
        scratch_shapes = []
    else:
        kernel = _make_acc_kernel(n_chunks, chunk)
        scratch_shapes = [pltpu.VMEM((tile_m, Cout_p), jnp.float32)]

    def build(single_buffer_consts):
        def const_spec(shape, imap, is_const):
            if single_buffer_consts and is_const:
                # Constant-index block: the second pipeline buffer is waste.
                return pl.BlockSpec(shape, imap, pipeline_mode=pl.Buffered(1))
            return pl.BlockSpec(shape, imap)

        weights_const = (n_h == 1)   # w1 / b1 / w2 vary only with j
        grid_spec = pltpu.PrefetchScalarGridSpec(
            num_scalar_prefetch=0,
            grid=(n_m, n_h),
            in_specs=[
                pl.BlockSpec((tile_m, Cin), lambda i, j: (i, 0)),
                const_spec((Cin, tile_h), lambda i, j: (0, j), weights_const),
                const_spec((1, tile_h), lambda i, j: (0, j), weights_const),
                const_spec((tile_h, Cout_p), lambda i, j: (j, 0), weights_const),
                const_spec((1, Cout_p), lambda i, j: (0, 0), True),
            ],
            out_specs=pl.BlockSpec((tile_m, Cout_p), lambda i, j: (i, 0)),
            scratch_shapes=scratch_shapes,
        )
        return pl.pallas_call(
            kernel,
            out_shape=out_shape,
            grid_spec=grid_spec,
            compiler_params=cparams,
        )

    args = (x2d, w1, b1_2d, w2, b2_2d)

    # Narrowed fallback: only catch errors plausibly caused by pl.Buffered(1)
    # being unsupported in this jax/Mosaic version.
    fallback_errors = [TypeError, ValueError, NotImplementedError]
    for exc in (getattr(pltpu, "LoweringException", None),
                getattr(jax.errors, "JaxRuntimeError", None)):
        if isinstance(exc, type) and issubclass(exc, Exception):
            fallback_errors.append(exc)
    fallback_errors = tuple(fallback_errors)

    try:
        out2d = build(True)(*args)
    except fallback_errors:
        # pl.Buffered(1) rejected: fall back to default double buffering
        # (correct, slightly more VMEM).
        out2d = build(False)(*args)

    out2d = out2d[:M, :Cout]
    return out2d.reshape(*orig_lead, Cout)


def mlp_reference(x, w1, b1, w2, b2):
    h = jnp.dot(x, w1) + b1
    h = 0.5 * h * (1.0 + jax.lax.erf(h / jnp.sqrt(2.0).astype(h.dtype)))
    return jnp.dot(h, w2) + b2


if __name__ == "__main__":
    key = jax.random.PRNGKey(0)

    def make_params(key, cin, hid, cout):
        kw1, kb1, kw2, kb2 = jax.random.split(key, 4)
        lim1 = 1.0 / math.sqrt(cin)
        w1 = jax.random.uniform(kw1, (cin, hid), minval=-lim1, maxval=lim1,
                                dtype=jnp.float32)
        b1 = jax.random.uniform(kb1, (hid,), minval=-lim1, maxval=lim1,
                                dtype=jnp.float32)
        lim2 = 1.0 / math.sqrt(hid)
        w2 = jax.random.uniform(kw2, (hid, cout), minval=-lim2, maxval=lim2,
                                dtype=jnp.float32)
        b2 = jax.random.uniform(kb2, (cout,), minval=-lim2, maxval=lim2,
                                dtype=jnp.float32)
        return w1, b1, w2, b2

    k1, k2, k3, kx1, kx2, kx3 = jax.random.split(key, 6)

    # Test 1: single hidden tile, direct-write kernel, Cout padding 64 -> 128.
    B, N, Cin, Hid, Cout = 2, 16, 64, 128, 64
    x = jax.random.normal(kx1, (B, N, Cin), dtype=jnp.float32)
    w1, b1, w2, b2 = make_params(k1, Cin, Hid, Cout)
    out = jax.block_until_ready(mlp_pallas(x, w1, b1, w2, b2))
    ref = mlp_reference(x, w1, b1, w2, b2)
    assert out.shape == (B, N, Cout)
    assert jnp.allclose(out, ref, atol=1e-4, rtol=1e-4), "mismatch (test 1)"

    # Test 2: forces M padding + hidden-dim reduction grid axis (n_h = 2).
    B2, N2, Cin2, Hid2, Cout2 = 2, 12, 64, 256, 64
    x2 = jax.random.normal(kx2, (B2, N2, Cin2), dtype=jnp.float32)
    w1b, b1b, w2b, b2b = make_params(k2, Cin2, Hid2, Cout2)
    out2 = jax.block_until_ready(
        mlp_pallas(x2, w1b, b1b, w2b, b2b, tile_m=16, tile_h=128))
    ref2 = mlp_reference(x2, w1b, b1b, w2b, b2b)
    assert out2.shape == (B2, N2, Cout2)
    assert jnp.allclose(out2, ref2, atol=1e-4, rtol=1e-4), "mismatch (test 2)"

    # Test 3: in-kernel hidden chunking (tile_h = 1024 -> 2 chunks of 512).
    B3, N3, Cin3, Hid3, Cout3 = 2, 16, 64, 1024, 96
    x3 = jax.random.normal(kx3, (B3, N3, Cin3), dtype=jnp.float32)
    w1c, b1c, w2c, b2c = make_params(k3, Cin3, Hid3, Cout3)
    out3 = jax.block_until_ready(mlp_pallas(x3, w1c, b1c, w2c, b2c))
    ref3 = mlp_reference(x3, w1c, b1c, w2c, b2c)
    assert out3.shape == (B3, N3, Cout3)
    assert jnp.allclose(out3, ref3, atol=1e-4, rtol=1e-4), "mismatch (test 3)"

    # Test 4: bf16 MXU-input path (f32 accumulation), looser tolerance.
    out4 = jax.block_until_ready(
        mlp_pallas(x, w1, b1, w2, b2, compute_dtype=jnp.bfloat16))
    assert out4.shape == (B, N, Cout)
    assert jnp.allclose(out4, ref, atol=7.5e-2, rtol=7.5e-2), "mismatch (test 4)"

    print("KERNEL_OK")
</pallas_src>

<mosaic_0001>
module attributes {stable_mosaic.version = 11 : i64} {
  func.func @kernel(%arg0: i32, %arg1: i32, %arg2: memref<16x64xf32, #tpu.memory_space<vmem>>, %arg3: memref<64x128xf32, #tpu.memory_space<vmem>>, %arg4: memref<1x128xf32, #tpu.memory_space<vmem>>, %arg5: memref<128x128xf32, #tpu.memory_space<vmem>>, %arg6: memref<1x128xf32, #tpu.memory_space<vmem>>, %arg7: memref<16x128xf32, #tpu.memory_space<vmem>>) attributes {dimension_semantics = [#tpu.dimension_semantics<parallel>, #tpu.dimension_semantics<arbitrary>], iteration_bounds = array<i64: 2, 1>, scalar_prefetch = 0 : i64, scratch_operands = 0 : i64, tpu.core_type = #tpu.core_type<tc>, window_params = [{transform_indices = @transform_0, window_bounds = array<i64: 16, 64>}, {pipeline_mode = #tpu.pipeline_mode<synchronous>, transform_indices = @transform_1, window_bounds = array<i64: 64, 128>}, {pipeline_mode = #tpu.pipeline_mode<synchronous>, transform_indices = @transform_2, window_bounds = array<i64: 1, 128>}, {pipeline_mode = #tpu.pipeline_mode<synchronous>, transform_indices = @transform_3, window_bounds = array<i64: 128, 128>}, {pipeline_mode = #tpu.pipeline_mode<synchronous>, transform_indices = @transform_4, window_bounds = array<i64: 1, 128>}, {transform_indices = @transform_5, window_bounds = array<i64: 16, 128>}]} {
    %c0 = arith.constant 0 : index
    %c0_0 = arith.constant 0 : index
    %0 = vector.load %arg2[%c0, %c0_0] : memref<16x64xf32, #tpu.memory_space<vmem>>, vector<16x64xf32>
    %c0_1 = arith.constant 0 : index
    %c0_2 = arith.constant 0 : index
    %1 = vector.load %arg6[%c0_1, %c0_2] : memref<1x128xf32, #tpu.memory_space<vmem>>, vector<1x128xf32>
    %2 = vector.shape_cast %1 : vector<1x128xf32> to vector<1x128xf32>
    %3 = vector.broadcast %2 : vector<1x128xf32> to vector<16x128xf32>
    %c0_3 = arith.constant 0 : index
    %c0_4 = arith.constant 0 : index
    %4 = vector.load %arg7[%c0_3, %c0_4] : memref<16x128xf32, #tpu.memory_space<vmem>>, vector<16x128xf32>
    tpu.vector_store %arg7[%c0_3, %c0_4], %3 {strides = array<i32>} : memref<16x128xf32, #tpu.memory_space<vmem>>, vector<16x128xf32>,
    %c0_i32 = arith.constant 0 : i32
    %c128_i32 = arith.constant 128 : i32
    %5 = arith.muli %c0_i32, %c128_i32 : i32
    %6 = tpu.assume_multiple %5, 128 : i32
    %c0_5 = arith.constant 0 : index
    %7 = arith.index_cast %6 : i32 to index
    %8 = vector.load %arg3[%c0_5, %7] : memref<64x128xf32, #tpu.memory_space<vmem>>, vector<64x128xf32>
    %cst = arith.constant dense<0.000000e+00> : vector<16x128xf32>
    %9 = tpu.matmul %0, %8, %cst {dimension_numbers = #tpu.dot_dimension_numbers<[1], [0], [0], [1], [0, 0, 1, 1], [], []>} : vector<16x64xf32>, vector<64x128xf32>, vector<16x128xf32> -> vector<16x128xf32>
    %c0_6 = arith.constant 0 : index
    %10 = arith.index_cast %6 : i32 to index
    %11 = vector.load %arg4[%c0_6, %10] : memref<1x128xf32, #tpu.memory_space<vmem>>, vector<1x128xf32>
    %12 = vector.broadcast %11 : vector<1x128xf32> to vector<16x128xf32>
    %13 = arith.addf %9, %12 : vector<16x128xf32>
    %cst_7 = arith.constant 5.000000e-01 : f32
    %14 = vector.broadcast %cst_7 : f32 to vector<16x128xf32>
    %15 = arith.mulf %14, %13 : vector<16x128xf32>
    %cst_8 = arith.constant 0.707106769 : f32
    %16 = vector.broadcast %cst_8 : f32 to vector<16x128xf32>
    %17 = arith.mulf %13, %16 : vector<16x128xf32>
    %18 = math.erf %17 : vector<16x128xf32>
    %cst_9 = arith.constant 1.000000e+00 : f32
    %19 = vector.broadcast %cst_9 : f32 to vector<16x128xf32>
    %20 = arith.addf %19, %18 : vector<16x128xf32>
    %21 = arith.mulf %15, %20 : vector<16x128xf32>
    %c0_10 = arith.constant 0 : index
    %c0_11 = arith.constant 0 : index
    %22 = vector.load %arg7[%c0_10, %c0_11] : memref<16x128xf32, #tpu.memory_space<vmem>>, vector<16x128xf32>
    %23 = arith.index_cast %6 : i32 to index
    %c0_12 = arith.constant 0 : index
    %24 = vector.load %arg5[%23, %c0_12] : memref<128x128xf32, #tpu.memory_space<vmem>>, vector<128x128xf32>
    %cst_13 = arith.constant dense<0.000000e+00> : vector<16x128xf32>
    %25 = tpu.matmul %21, %24, %cst_13 {dimension_numbers = #tpu.dot_dimension_numbers<[1], [0], [0], [1], [0, 0, 1, 1], [], []>} : vector<16x128xf32>, vector<128x128xf32>, vector<16x128xf32> -> vector<16x128xf32>
    %26 = arith.addf %22, %25 : vector<16x128xf32>
    %c0_14 = arith.constant 0 : index
    %c0_15 = arith.constant 0 : index
    %27 = vector.load %arg7[%c0_14, %c0_15] : memref<16x128xf32, #tpu.memory_space<vmem>>, vector<16x128xf32>
    tpu.vector_store %arg7[%c0_14, %c0_15], %26 {strides = array<i32>} : memref<16x128xf32, #tpu.memory_space<vmem>>, vector<16x128xf32>,
    %c1_i32 = arith.constant 1 : i32
    return
  }
  func.func @transform_0(%arg0: i32, %arg1: i32) -> (i32, i32) {
    %c0_i32 = arith.constant 0 : i32
    %c0_i32_0 = arith.constant 0 : i32
    return %arg0, %c0_i32 : i32, i32
  }
  func.func @transform_1(%arg0: i32, %arg1: i32) -> (i32, i32) {
    %c0_i32 = arith.constant 0 : i32
    %c0_i32_0 = arith.constant 0 : i32
    return %c0_i32, %arg1 : i32, i32
  }
  func.func @transform_2(%arg0: i32, %arg1: i32) -> (i32, i32) {
    %c0_i32 = arith.constant 0 : i32
    %c0_i32_0 = arith.constant 0 : i32
    return %c0_i32, %arg1 : i32, i32
  }
  func.func @transform_3(%arg0: i32, %arg1: i32) -> (i32, i32) {
    %c0_i32 = arith.constant 0 : i32
    %c0_i32_0 = arith.constant 0 : i32
    return %arg1, %c0_i32 : i32, i32
  }
  func.func @transform_4(%arg0: i32, %arg1: i32) -> (i32, i32) {
    %c0_i32 = arith.constant 0 : i32
    %c0_i32_0 = arith.constant 0 : i32
    %c0_i32_1 = arith.constant 0 : i32
    return %c0_i32, %c0_i32_0 : i32, i32
  }
  func.func @transform_5(%arg0: i32, %arg1: i32) -> (i32, i32) {
    %c0_i32 = arith.constant 0 : i32
    %c0_i32_0 = arith.constant 0 : i32
    return %arg0, %c0_i32 : i32, i32
  }
}

</mosaic_0001>

<bundles_post_ra>
// kernel: tpu_custom_call.1
= control target key start
LH: loop header
LB: loop body
LE: loop exit
PB: predicated region body
PF: predicated region fallthrough
CT: control target
= control target key end

     0   :  { %10 = vsyncpa [#allocation3], 0  ;;  %s1400_s0 = inlined_call_operand.hbm [shape: f32[32,64], index: 0, kind: input, shape index: {}]   ;;  %s1401_s1 = inlined_call_operand.hbm [shape: f32[64,128], index: 1, kind: input, shape index: {}]   ;;  %s1402_s2 = inlined_call_operand.vmem [shape: f32[1,128], index: 2, kind: input, shape index: {}]   ;;  %s1403_s3 = inlined_call_operand.hbm [shape: f32[128,128], index: 3, kind: input, shape index: {}]   ;;  %s1404_s4 = inlined_call_operand.vmem [shape: f32[1,128], index: 4, kind: input, shape index: {}]   ;;  %s1405_s5 = inlined_call_operand.hbm [shape: f32[32,128], index: 5, kind: output, shape index: {}]  }
   0x1   :  { %12 = vsyncpa [#allocation3 + $0x1], 0 }
   0x2   :  { %13 = vsyncpa [#allocation6], 0 }
   0x3   :  { %14 = vsyncpa [#allocation4], 0 }
   0x4   :  { %16 = vsyncpa [#allocation4 + $0x1], 0  ;;  %s1120_s18 = smov 0   ;;  %s1122_s19 = smov 0  }
   0x5   :  { %s1124_s20 = smov 0   ;;  %s1126_s21 = smov 0  }
   0x6   :  { %s1128_s22 = smov 0   ;;  %s1130_s23 = smov 0  }
   0x7 LB: > { %s661_s24 = sadd.s32 4294967295, %s1080_s23   ;;  %s662_s25 = sadd.s32 4294967294, %s1080_s23   ;;  %s1080_s23 = sphi %s1130_s23, %s22_s23   ;;  %s1076_s22 = sphi %s1128_s22, %s1429_s22   ;;  %s1072_s21 = sphi %s1126_s21, %s1428_s21   ;;  %s1068_s20 = sphi %s1124_s20, %s1427_s20   ;;  %s1064_s19 = sphi %s1122_s19, %s1426_s19   ;;  %s1060_s18 = sphi %s1120_s18, %s1425_s18  }
   0x8   : > { %p54_p0 = scmp.ne.s32.totalorder %s1064_s19, %s1060_s18  ;;  %p1154_p1 = scmp.eq.s32.totalorder %s661_s24, 0 }
   0x9   : > { %p1158_p2 = scmp.eq.s32.totalorder %s661_s24, 1  ;;  %p183_p3 = scmp.eq.s32.totalorder %s662_s25, 1 }
   0xa   : > { %s1411_s26 = scalar_select %p1154_p1, 1, 0 }
   0xb   : > { %p1164_p4 = por %p1154_p1, %p54_p0  ;;  %p663_p5 = scmp.ge.s32.totalorder %s1080_s23, 1 }
   0xc   : > { %p1169_p6 = por %p183_p3, %p54_p0  ;;  %p190_p7 = scmp.lt.s32.totalorder %s1080_s23, 3 }
   0xd   : > { %s1413_s28 = scalar_select %p1164_p4, 1, 0 }
   0xe   : > { %s1414_s29 = scalar_select %p1169_p6, 1, 0 }
   0xf   : > { %p1174_p8 = pnand %p663_p5, %p190_p7  ;;  %s1082_s6 = smov [#allocation5]  }
  0x10   : > { %s204_s7 = sshll.u32 %s1082_s6, 4  ;;  %s1083_s9 = smov [#allocation7]   ;;  %s1178_s7 = int_to_ptr.vmem [resolvable:$true] %s204_s7 }
  0x11   : > { %p829_p9 = pneg %p1174_p8  ;;  %s226_s10 = sshll.u32 %s1083_s9, 4  ;;  %s1189_s10 = int_to_ptr.vmem [resolvable:$true] %s226_s10 }
  0x12   : > { %s908_s13 = scalar_lea.hbm %s1401_s1, 1024 }
  0x13   : > { %p1185_p11 = pnand %p829_p9, %p1154_p1  ;;  %p909_p12 = scmp.ne.s32.totalorder %s1401_s1, %s908_s13 }
  0x14   : > { %p915_p5 = scmp.lt.u32.totalorder %s908_s13, %s1401_s1 }
  0x15   : > { %p910_p13 = pneg %p1185_p11 }
  0x17   : > { %p911_p0 = pnand %p910_p13, %p909_p12 }
  0x19   : > { %p912_p3 = pneg %p911_p0 }
  0x1b   : > { %p917_p7 = pnand %p915_p5, %p912_p3 }
  0x1d   : > { %920 = shalt.err (!%p917_p7)
}
  0x1e   : > { %s921_s24 = scalar_lea.vmem %s1178_s7, 1024  ;;  %p929_p1 = scmp.lt.s32.totalorder %s1178_s7, %s1178_s7 }
  0x1f   : > { %p922_p9 = scmp.ne.s32.totalorder %s1178_s7, %s921_s24  ;;  %p930_p12 = scmp.lt.s32.totalorder %s921_s24, %s921_s24 }
  0x21   : > { %p924_p10 = pnand %p922_p9, %p910_p13  ;;  %p931_p0 = por %p930_p12, %p929_p1 }
  0x23   : > { %p925_p6 = pneg %p924_p10 }
  0x25   : > { %p932_p4 = pnand %p931_p0, %p925_p6 }
  0x27   : > { %935 = shalt.err (!%p932_p4)
}
  0x28   : > { %s1409_s25 = smov 128   ;;  %s1085_s6 = smov 8  }
  0x29   : > { %832 = dma.hbm_to_vmem [thread:$0]  (!%p1185_p11), %s1401_s1, 1024, %s1178_s7, [#allocation6], %s1409_s25, %s1409_s25, %s1085_s6  }
  0x2a   : > { %s936_s14 = scalar_lea.hbm %s1403_s3, 2048 }
  0x2b   : > { %p937_p1 = scmp.ne.s32.totalorder %s1403_s3, %s936_s14  ;;  %p943_p10 = scmp.lt.u32.totalorder %s936_s14, %s1403_s3 }
  0x2d   : > { %p939_p4 = pnand %p937_p1, %p910_p13 }
  0x2f   : > { %p940_p6 = pneg %p939_p4 }
  0x31   : > { %p945_p3 = pnand %p943_p10, %p940_p6 }
  0x33   : > { %948 = shalt.err (!%p945_p3)
}
  0x34   : > { %s949_s7 = scalar_lea.vmem %s1189_s10, 2048  ;;  %p957_p12 = scmp.lt.s32.totalorder %s1189_s10, %s1189_s10 }
  0x35   : > { %p950_p5 = scmp.ne.s32.totalorder %s1189_s10, %s949_s7  ;;  %p958_p0 = scmp.lt.s32.totalorder %s949_s7, %s949_s7 }
  0x37   : > { %p952_p7 = pnand %p950_p5, %p910_p13  ;;  %p959_p1 = por %p958_p0, %p957_p12 }
  0x39   : > { %p953_p9 = pneg %p952_p7 }
  0x3b   : > { %p960_p4 = pnand %p959_p1, %p953_p9 }
  0x3d   : > { %963 = shalt.err (!%p960_p4)
}
  0x3e   : > { %835 = dma.hbm_to_vmem [thread:$0]  (!%p1185_p11), %s1403_s3, 2048, %s1189_s10, [#allocation6], %s1409_s25, %s1409_s25, %s1085_s6  }
  0x3f   : > { %s34_s8 = sadd.s32 1, %s1076_s22  ;;  %s41_s12 = sadd.s32 1, %s1068_s20 }
  0x40   : > { %p36_p13 = scmp.ge.s32.totalorder %s34_s8, 2  ;;  %p48_p6 = scmp.ne.s32.totalorder %s1068_s20, %s1064_s19 }
  0x41   : > { %p49_p10 = scmp.eq.s32.totalorder %s1080_s23, 0  ;;  %p846_p3 = scmp.lt.s32.totalorder %s1080_s23, 2 }
  0x42   : > { %s1431_s8 = smov (%p36_p13, %s34_s8), 0  ;;  %p1259_p7 = por %p1158_p2, %p48_p6 }
  0x43   : > { %p50_p5 = por %p49_p10, %p48_p6  ;;  %s38_s14 = ssub.s32 %s1076_s22, %s1431_s8 }
  0x44   : > { %s1417_s13 = scalar_select %p1259_p7, 1, 0 }
  0x45   : > { %s243_s15 = sand.u32 1, %s1068_s20   ;;  %p39_p9 = scmp.eq.s32.totalorder %s38_s14, 0 }
  0x46   : > { %s668_s10 = sshll.u32 %s243_s15, 4  ;;  %s685_s16 = sshll.u32 %s1076_s22, 8 }
  0x47   : > { %s1268_s17 = scalar_select %p39_p9, %s1068_s20, %s41_s12  }
  0x48   : > { %s1273_s9 = scalar_lea.hbm %s1400_s0, %s685_s16  ;;  %s247_s27 = scalar_lea.vmem [#allocation2], %s668_s10 }
  0x49   : > { %s254_s11 = sshll.u32 %s247_s27, 4  ;;  %p1277_p2 = pnand %p846_p3, %p50_p5  ;;  %s1281_s11 = int_to_ptr.vmem [resolvable:$true] %s254_s11 }
  0x4a   : > { %s1283_s12 = scalar_lea.sflag [#allocation3], %s243_s15  ;;  %s964_s14 = scalar_lea.hbm %s1273_s9, 256 }
  0x4b   : > { %p965_p11 = scmp.ne.s32.totalorder %s1273_s9, %s964_s14  ;;  %p966_p12 = pneg %p1277_p2 }
  0x4c   : > { %s969_s24 = scalar_lea.hbm %s1400_s0, 512  ;;  %p970_p4 = scmp.lt.u32.totalorder %s1273_s9, %s1400_s0 }
  0x4d   : > { %p967_p0 = pnand %p966_p12, %p965_p11  ;;  %p971_p13 = scmp.lt.u32.totalorder %s969_s24, %s964_s14 }
  0x4e   : > { %p973_p10 = scmp.lt.u32.totalorder %s964_s14, %s1273_s9 }
  0x4f   : > { %p968_p1 = pneg %p967_p0  ;;  %p972_p6 = por %p971_p13, %p970_p4 }
  0x51   : > { %p974_p3 = por %p973_p10, %p972_p6 }
  0x53   : > { %p975_p5 = pnand %p974_p3, %p968_p1 }
  0x55   : > { %978 = shalt.err (!%p975_p5)
}
  0x56   : > { %s979_s15 = scalar_lea.vmem %s1281_s11, 256  ;;  %s1086_s10 = smov [#allocation2]  }
  0x57   : > { %p980_p9 = scmp.ne.s32.totalorder %s1281_s11, %s979_s15  ;;  %s984_s16 = sshll.u32 %s1086_s10, 4  ;;  %s985_s16 = int_to_ptr.vmem [resolvable:$false] %s984_s16 }
  0x58   : > { %s986_s7 = scalar_lea.vmem %s985_s16, 512  ;;  %p987_p7 = scmp.lt.s32.totalorder %s1281_s11, %s985_s16 }
  0x59   : > { %p982_p11 = pnand %p980_p9, %p966_p12  ;;  %p988_p4 = scmp.lt.s32.totalorder %s986_s7, %s979_s15 }
  0x5b   : > { %p983_p0 = pneg %p982_p11  ;;  %p989_p13 = por %p988_p4, %p987_p7 }
  0x5d   : > { %p990_p6 = pnand %p989_p13, %p983_p0 }
  0x5f   : > { %993 = shalt.err (!%p990_p6)
}
  0x60   : > { %s1419_s14 = smov 128   ;;  %266 = sbr.rel (%p1174_p8) target bundleno = 589 (0x24d), region = 40 }
  0x61   : > { %839 = dma.hbm_to_vmem [thread:$0]  (!%p1277_p2), %s1273_s9, 256, %s1281_s11, %s1283_s12, %s1419_s14, %s1419_s14, %s1085_s6  }
  0x62   : > { %s1317_s24 = sand.u32 (!%p1174_p8), 1, %s1064_s19   ;;  %p1420_p7 = scmp.ne.s32.totalorder (!%p1174_p8), %s1413_s28, 0 }
  0x63   : > { %s672_s27 = sshll.u32 (!%p1174_p8), %s1317_s24, 4  ;;  %s269_s15 = scalar_lea.sflag (!%p1174_p8), [#allocation3], %s1317_s24 }
  0x64   : > { %s1323_s25 = scalar_lea.vmem (!%p1174_p8), [#allocation2], %s672_s27 }
  0x67   : > { %1047 = dma.done.wait (%p1420_p7), %s269_s15, 256  }
  0x68   : > { %1049 = vsyncadd (%p1420_p7), %s269_s15, 4294967040  ;;  %p1421_p2 = scmp.ne.s32.totalorder %s1411_s26, 0 }
  0x6a   : > { %1051 = dma.done.wait (%p1421_p2), [#allocation6], 3072  }
  0x6b   : > { %1053 = vsyncadd (%p1421_p2), [#allocation6], 4294964224  ;;  %v327_v0 = vld [vmem:[#allocation5] sm:$0xff]  ;;  %v328_v1 = vld [vmem:[#allocation5 + $0x8] sm:$0xff]  ;;  %vm342_vm0 = vcmask 523264   ;;  %s686_s9 = sshll.u32 %s1072_s21, 8 }
  0x6c   : > { %v329_v2 = vld [vmem:[#allocation5 + $0x10] sm:$0xff]  ;;  %v769_v3 = vpack.c.bf16 %v328_v1, %v327_v0  ;;  %v330_v4 = vld [vmem:[#allocation5 + $0x18] sm:$0xff]  ;;  %v331_v6 = vld [vmem:[#allocation5 + $0x20] sm:$0xff]  ;;  %s309_s11 = scalar_lea.vmem [#allocation8], %s672_s27  ;;  %s1349_s7 = scalar_lea.hbm %s1405_s5, %s686_s9 }
  0x6d   : > { %v773_v5 = vpack.c.bf16 %v330_v4, %v329_v2  ;;  %v332_v7 = vld [vmem:[#allocation5 + $0x28] sm:$0xff]  ;;  %v316_v8 = vld [vmem:[%s1323_s25] sm:$0xff]  ;;  %v439_v13 = vld [vmem:[#allocation7 + $0x18] sm:$0xff]  ;;  %s545_s12 = sshll.u32 %s309_s11, 4  ;;  %s532_s21 = scalar_lea.sflag [#allocation4], %s1317_s24  ;;  %s1351_s12 = int_to_ptr.vmem [resolvable:$true] %s545_s12 }
  0x6e   : > { %770 = vmatprep.subr.bf16.mxu0 %v769_v3  ;;  %731 = vmatprep.mubr.msk.f32.mxu0 %vm342_vm0, %v316_v8  ;;  %v436_v9 = vld [vmem:[#allocation7] sm:$0xff]  ;;  %v437_v10 = vld [vmem:[#allocation7 + $0x8] sm:$0xff]  ;;  %v438_v12 = vld [vmem:[#allocation7 + $0x10] sm:$0xff]  ;;  %v777_v14 = vpack.c.bf16 %v332_v7, %v331_v6  ;;  %s994_s14 = scalar_lea.vmem %s1351_s12, 256  ;;  %p1422_p12 = scmp.ne.s32.totalorder %s1417_s13, 0 }
  0x6f   : > { %772 = vmatpush3.bf16.msra.mxu0 %v769_v3  ;;  %v785_v11 = vpack.c.bf16 %v437_v10, %v436_v9  ;;  %v789_v15 = vpack.c.bf16 %v439_v13, %v438_v12  ;;  %v440_v16 = vld [vmem:[#allocation7 + $0x20] sm:$0xff]  ;;  %v441_v17 = vld [vmem:[#allocation7 + $0x28] sm:$0xff]  ;;  %v333_v18 = vld [vmem:[#allocation5 + $0x30] sm:$0xff]  ;;  %p995_p8 = scmp.ne.s32.totalorder %s1351_s12, %s994_s14  ;;  %s1087_s27 = smov [#allocation8]  }
  0x70   : > { %774 = vmatprep.subr.bf16.mxu0 %v773_v5  ;;  %v334_v19 = vld [vmem:[#allocation5 + $0x38] sm:$0xff]  ;;  %v793_v20 = vpack.c.bf16 %v441_v17, %v440_v16  ;;  %v442_v23 = vld [vmem:[#allocation7 + $0x30] sm:$0xff]  ;;  %v444_v26 = vld [vmem:[#allocation7 + $0x40] sm:$0xff]  ;;  %s998_s15 = sshll.u32 %s1087_s27, 4  ;;  %s999_s15 = int_to_ptr.vmem [resolvable:$false] %s998_s15 }
  0x71   : > { %786 = vmatprep.subr.bf16.mxu1 %v785_v11  ;;  %v781_v21 = vpack.c.bf16 %v334_v19, %v333_v18  ;;  %v317_v22 = vld [vmem:[%s1323_s25 + $0x8] sm:$0xff]  ;;  %v446_v29 = vld [vmem:[#allocation7 + $0x50] sm:$0xff]  ;;  %v448_v32 = vld [vmem:[#allocation7 + $0x60] sm:$0xff]  ;;  %p996_p1 = pnand %p995_p8, %p1422_p12  ;;  %s1000_s25 = scalar_lea.vmem %s999_s15, 512 }
  0x72   : > { %788 = vmatpush3.bf16.msra.mxu1 %v785_v11  ;;  %v443_v24 = vld [vmem:[#allocation7 + $0x38] sm:$0xff]  ;;  %v445_v27 = vld [vmem:[#allocation7 + $0x48] sm:$0xff]  ;;  %v450_v35 = vld [vmem:[#allocation7 + $0x70] sm:$0xff]  ;;  %p1001_p3 = scmp.lt.s32.totalorder %s1351_s12, %s999_s15  ;;  %p1002_p5 = scmp.lt.s32.totalorder %s1000_s25, %s994_s14 }
  0x73   : > { %776 = vmatpush3.bf16.msra.mxu0 %v773_v5  ;;  %790 = vmatprep.subr.bf16.mxu1 %v789_v15  ;;  %v797_v25 = vpack.c.bf16 %v443_v24, %v442_v23  ;;  %v801_v28 = vpack.c.bf16 %v445_v27, %v444_v26  ;;  %v447_v30 = vld [vmem:[#allocation7 + $0x58] sm:$0xff]  ;;  %v449_v33 = vld [vmem:[#allocation7 + $0x68] sm:$0xff]  ;;  %v677_v38 = vld [vmem:[%s1402_s2] ss:$0 sm:$0xff]  ;;  %p997_p10 = pneg %p996_p1 }
  0x74   : > { %778 = vmatprep.subr.bf16.mxu0 %v777_v14  ;;  %v805_v31 = vpack.c.bf16 %v447_v30, %v446_v29  ;;  %v809_v34 = vpack.c.bf16 %v449_v33, %v448_v32  ;;  %v451_v36 = vld [vmem:[#allocation7 + $0x78] sm:$0xff]  ;;  %v676_v53 = vld [vmem:[%s1404_s4] ss:$0 sm:$0xff]  ;;  %p1003_p9 = por %p1002_p5, %p1001_p3 }
  0x75   : > { %v813_v37 = vpack.c.bf16 %v451_v36, %v450_v35 }
  0x76   : > { %792 = vmatpush3.bf16.msra.mxu1 %v789_v15  ;;  %p1004_p11 = pnand %p1003_p9, %p997_p10 }
  0x77   : > { %780 = vmatpush3.bf16.msra.mxu0 %v777_v14  ;;  %794 = vmatprep.subr.bf16.mxu1 %v793_v20 }
  0x78   : > { %782 = vmatprep.subr.bf16.mxu0 %v781_v21 }
  0x7a   : > { %796 = vmatpush3.bf16.msra.mxu1 %v793_v20 }
  0x7b   : > { %784 = vmatpush3.bf16.msra.mxu0 %v781_v21  ;;  %798 = vmatprep.subr.bf16.mxu1 %v797_v25 }
  0x7e   : > { %732 = vmatmul.mubr.msk.f32.vlgmr.msra.gmra.mrb[0].mxu0 %vm342_vm0, %v317_v22  ;;  %800 = vmatpush3.bf16.msra.mxu1 %v797_v25 }
  0x7f   : > { %802 = vmatprep.subr.bf16.mxu1 %v801_v28 }
  0x82   : > { %804 = vmatpush3.bf16.msra.mxu1 %v801_v28 }
  0x83   : > { %806 = vmatprep.subr.bf16.mxu1 %v805_v31 }
  0x86   : > { %808 = vmatpush3.bf16.msra.mxu1 %v805_v31 }
  0x87   : > { %810 = vmatprep.subr.bf16.mxu1 %v809_v34 }
  0x8a   : > { %812 = vmatpush3.bf16.msra.mxu1 %v809_v34 }
  0x8b   : > { %814 = vmatprep.subr.bf16.mxu1 %v813_v37 }
  0x8e   : > { %816 = vmatpush3.bf16.msra.mxu1 %v813_v37 }
 0x151   : > { %v733_v39 = vpop.f32.mrb[0].mxu0 }
 0x152   : > { %v421_v40 = vadd.f32 %v733_v39, %v677_v38  ;;  %v415_v41 = vpop.f32.mrb[1].mxu0 }
 0x153   : > { %v416_v42 = vadd.f32 %v677_v38, %v415_v41 }
 0x154   : > { %v427_v43 = vmul.f32 0.70710677, %v421_v40  ;;  %v425_v50 = vmul.f32 0.5, %v421_v40 }
 0x155   : > { %v426_v44 = vmul.f32 0.70710677, %v416_v42  ;;  %v424_v48 = vmul.f32 0.5, %v416_v42 }
 0x156   : > { %904 = verf.f32 %v427_v43 }
 0x157   : > { %906 = verf.f32 %v426_v44 }
 0x160   : > { %v905_v45 = vpop.eup %904 }
 0x161   : > { %v907_v46 = vpop.eup %906  ;;  %v431_v47 = vadd.f32 1.0, %v905_v45 }
 0x162   : > { %v430_v49 = vadd.f32 1.0, %v907_v46 }
 0x163   : > { %v433_v52 = vmul.f32 %v431_v47, %v425_v50 }
 0x164   : > { %v432_v51 = vmul.f32 %v430_v49, %v424_v48 }
 0x166   : > { %766 = vmatprep.mubr.f32.mxu1 %v432_v51 }
 0x167   : > { %767 = vmatmul.mubr.f32.vlgmr.msra.gmra.mrb[0].mxu1 %v433_v52 }
 0x23a   : > { %v768_v54 = vpop.f32.mrb[0].mxu1 }
 0x23b   : > { %v528_v55 = vadd.f32 %v768_v54, %v676_v53  ;;  %v518_v56 = vpop.f32.mrb[1].mxu1 }
 0x23c   : > { %v527_v57 = vadd.f32 %v676_v53, %v518_v56 }
 0x23d   : > { %530 = vst [vmem:[%s309_s11 + $0x8] sm:$0xff] %v528_v55 }
 0x23e   : > { %529 = vst [vmem:[%s309_s11] sm:$0xff] %v527_v57 }
 0x23f   : > { %1007 = shalt.err (!%p1004_p11)
}
 0x240   : > { %s1008_s26 = scalar_lea.hbm %s1349_s7, 256  ;;  %s1012_s6 = scalar_lea.hbm %s1405_s5, 512 }
 0x241   : > { %p1009_p0 = scmp.ne.s32.totalorder %s1349_s7, %s1008_s26  ;;  %p1013_p6 = scmp.lt.u32.totalorder %s1349_s7, %s1405_s5 }
 0x242   : > { %p1014_p7 = scmp.lt.u32.totalorder %s1012_s6, %s1008_s26  ;;  %p1016_p8 = scmp.lt.u32.totalorder %s1008_s26, %s1349_s7 }
 0x243   : > { %p1010_p4 = pnand %p1009_p0, %p1422_p12 }
 0x244   : > { %p1015_p2 = por %p1014_p7, %p1013_p6 }
 0x245   : > { %p1011_p13 = pneg %p1010_p4 }
 0x246   : > { %p1017_p1 = por %p1016_p8, %p1015_p2 }
 0x248   : > { %p1018_p10 = pnand %p1017_p1, %p1011_p13 }
 0x24a   : > { %1021 = shalt.err (!%p1018_p10)
}
 0x24b   : > { %s1088_s10 = smov 128   ;;  %s1089_s16 = smov 8  }
 0x24c   : > { %827 = dma.vmem_to_hbm [thread:$0]  (%p1422_p12), %s1351_s12, 256, %s1349_s7, %s532_s21, %s1088_s10, %s1088_s10, %s1089_s16  }
 0x24d PF: > { %s560_s14 = sand.u32 1, %s1060_s18   ;;  %p1423_p3 = scmp.ne.s32.totalorder %s1414_s29, 0 }
 0x24e   : > { %p1424_p5 = scmp.ge.s32.totalorder %s1080_s23, 2  ;;  %s561_s27 = scalar_lea.sflag [#allocation4], %s560_s14 }
 0x250   : > { %p841_p9 = pnand %p1424_p5, %p1423_p3 }
 0x252   : > { %1055 = dma.done.wait (!%p841_p9), %s561_s27, 256  }
 0x253   : > { %1057 = vsyncadd (!%p841_p9), %s561_s27, 4294967040  ;;  %s22_s23 = sadd.s32 1, %s1080_s23   ;;  %s1425_s18 = smov %s1064_s19 }
 0x254   : > { %p19_p11 = scmp.ge.s32.totalorder %s22_s23, 4   ;;  %s1426_s19 = smov %s1068_s20 }
 0x255   : > { %s1427_s20 = smov %s1268_s17  ;;  %s1428_s21 = smov %s1076_s22 }
 0x256   : > { %s1429_s22 = smov %s1431_s8  ;;  %21 = sbr.rel (!%p19_p11) target bundleno = 7 (0x7), region = 98 }
 0x25d   :  { %566 = vsyncpa [#allocation3], 1 }
 0x25e   :  { %568 = vsyncpa [#allocation3 + $0x1], 1 }
 0x25f   :  { %569 = vsyncpa [#allocation6], 1 }
 0x260   :  { %570 = vsyncpa [#allocation4], 1 }
 0x261   :  { %572 = vsyncpa [#allocation4 + $0x1], 1 }

</bundles_post_ra>
